<compile_context>
chip_gen: v5e
topology: v5e:2x2
jax: 0.10.0
libtpu: 0.0.40
codegen_flags: <defaults>
</compile_context>

<pallas_src>
import functools

import jax
import jax.numpy as jnp
from jax.experimental import pallas as pl
from jax.experimental.pallas import tpu as pltpu

LN_EPS = 1e-5


def _round_up(v, m):
    return (v + m - 1) // m * m


def _pad2(x, rows, cols):
    return jnp.pad(x, ((0, rows - x.shape[0]), (0, cols - x.shape[1])))


def _default_vmem_limit():
    # Generation-aware VMEM budget (leave headroom for Mosaic internal scratch).
    try:
        cap = int(pltpu.get_tpu_info().vmem_capacity_bytes)
    except Exception:
        cap = 64 * 1024 * 1024
    return int(max(32 * 1024 * 1024, min(cap * 3 // 4, 100 * 1024 * 1024)))


_VMEM_LIMIT_BYTES = _default_vmem_limit()


def _layer_norm(x, gamma, beta, h_real, h_pad):
    # x: [*, h_pad] f32 with padded feature columns == 0; gamma/beta are
    # zero-padded, so padded output columns stay exactly 0.  Statistics are
    # corrected for the padded columns.
    mean = jnp.sum(x, axis=-1, keepdims=True) * (1.0 / h_real)
    d = x - mean
    s2 = jnp.sum(d * d, axis=-1, keepdims=True) - (h_pad - h_real) * mean * mean
    var = s2 * (1.0 / h_real)
    return d * jax.lax.rsqrt(var + LN_EPS) * gamma + beta


# ----------------------------------------------------------------------------
# Fused kernel: L message-passing layers + final LN + mean pool + head
# grid = (num_layers, row_tiles); all state carried in VMEM scratch.
# ----------------------------------------------------------------------------
def _mpnn_fused_kernel(xn0_ref, a_ref, w_ref, b_ref, g_ref, bt_ref,
                       wh_ref, bh_ref, o_ref,
                       xn_scr, xnw_scr, pooled_scr,
                       *, n_real, h_real, h_pad, tm):
    l = pl.program_id(0)
    i = pl.program_id(1)
    nl = pl.num_programs(0)
    ni = pl.num_programs(1)

    # --- very first grid step: load the initial normalized activations.
    @pl.when((l == 0) & (i == 0))
    def _init():
        xn_scr[...] = xn0_ref[...]

    # --- once per layer: xnw = LN(h) @ W[l]   (bf16 MXU, f32 accumulation)
    @pl.when(i == 0)
    def _layer_start():
        xnw_scr[...] = jnp.dot(
            xn_scr[...].astype(jnp.bfloat16), w_ref[...],
            preferred_element_type=jnp.float32).astype(jnp.bfloat16)

    # --- init the pooled accumulator before the last layer's row tiles.
    @pl.when((l == nl - 1) & (i == 0))
    def _pool_init():
        pooled_scr[...] = jnp.zeros_like(pooled_scr)

    # --- row tile: aggregate over the VMEM-resident adjacency, bias + relu,
    #     skip, then either the next layer's LN or the final LN + pooling.
    i_start = i * tm
    row = pl.ds(pl.multiple_of(i_start, tm), tm)

    agg = jnp.dot(a_ref[row, :], xnw_scr[...],
                  preferred_element_type=jnp.float32)
    out = jnp.maximum(agg + b_ref[...], 0.0)
    h_new = xn_scr[row, :] + out        # skip adds the LayerNorm'd input (ref)

    @pl.when(l < nl - 1)
    def _not_last():
        xn_scr[row, :] = _layer_norm(h_new, g_ref[...], bt_ref[...],
                                     h_real, h_pad)

    @pl.when(l == nl - 1)
    def _last():
        xnf = _layer_norm(h_new, g_ref[...], bt_ref[...], h_real, h_pad)
        rid = jax.lax.broadcasted_iota(jnp.int32, (tm, h_pad), 0) + i_start
        xnf = jnp.where(rid < n_real, xnf, 0.0)
        pooled_scr[...] += jnp.sum(xnf, axis=0, keepdims=True)

    # --- final grid step: mean pool + linear head.
    @pl.when((l == nl - 1) & (i == ni - 1))
    def _head():
        pooled = pooled_scr[...] * (1.0 / n_real)
        y = jnp.dot(pooled.astype(jnp.bfloat16), wh_ref[...],
                    preferred_element_type=jnp.float32)
        o_ref[...] = y + bh_ref[...]


def mpnn_fused(xn0_p, a_p, w_stack, b_stack, gamma, beta, w_head, b_head,
               *, n_real, h_real, tm):
    n_pad, h_pad = xn0_p.shape
    o_pad = w_head.shape[1]
    num_layers = w_stack.shape[0]
    ni = n_pad // tm

    kernel = functools.partial(_mpnn_fused_kernel, n_real=n_real,
                               h_real=h_real, h_pad=h_pad, tm=tm)

    c2 = lambda l, i: (0, 0)  # constant-index, VMEM-resident 2D blocks

    return pl.pallas_call(
        kernel,
        out_shape=jax.ShapeDtypeStruct((1, o_pad), jnp.float32),
        grid_spec=pltpu.PrefetchScalarGridSpec(
            num_scalar_prefetch=0,
            grid=(num_layers, ni),
            in_specs=[
                pl.BlockSpec((n_pad, h_pad), c2),          # xn0 (f32)
                pl.BlockSpec((n_pad, n_pad), c2),          # A   (bf16, resident)
                pl.BlockSpec((None, h_pad, h_pad),
                             lambda l, i: (l, 0, 0)),      # W[l] (bf16)
                pl.BlockSpec((None, 1, h_pad),
                             lambda l, i: (l, 0, 0)),      # b[l] (f32)
                pl.BlockSpec((1, h_pad), c2),              # ln gamma
                pl.BlockSpec((1, h_pad), c2),              # ln beta
                pl.BlockSpec((h_pad, o_pad), c2),          # W_head (bf16)
                pl.BlockSpec((1, o_pad), c2),              # b_head
            ],
            out_specs=pl.BlockSpec((1, o_pad), c2),
            scratch_shapes=[
                pltpu.VMEM((n_pad, h_pad), jnp.float32),   # xn  (carried, f32)
                pltpu.VMEM((n_pad, h_pad), jnp.bfloat16),  # xnw (per layer)
                pltpu.VMEM((1, h_pad), jnp.float32),       # pooled accumulator
            ],
        ),
        compiler_params=pltpu.CompilerParams(
            # both axes carry state through VMEM scratch -> sequential
            dimension_semantics=("arbitrary", "arbitrary"),
            vmem_limit_bytes=_VMEM_LIMIT_BYTES,
        ),
    )(xn0_p, a_p, w_stack, b_stack, gamma, beta, w_head, b_head)


# ----------------------------------------------------------------------------
# Glue: GCN-normalized dense adjacency D^-1/2 (A + I) D^-1/2 (bf16, padded)
# ----------------------------------------------------------------------------
def build_norm_adj(edge_index, num_nodes_padded):
    src, dst = edge_index[0], edge_index[1]
    a = jnp.zeros((num_nodes_padded, num_nodes_padded), jnp.float32)
    a = a.at[dst, src].set(1.0)                       # messages flow src -> dst
    # self loops without double-counting pre-existing ones
    a = jnp.maximum(a, jnp.eye(num_nodes_padded, dtype=jnp.float32))
    deg = jnp.sum(a, axis=1)
    d_inv_sqrt = jnp.where(deg > 0, jax.lax.rsqrt(deg), 0.0)
    a = d_inv_sqrt[:, None] * a * d_inv_sqrt[None, :]
    return a.astype(jnp.bfloat16)


# ----------------------------------------------------------------------------
# Full MPNN forward
# ----------------------------------------------------------------------------
@functools.partial(jax.jit, static_argnames=("num_layers",))
def mpnn_forward(x, edge_index, params, num_layers):
    n, in_dim = x.shape
    hidden = params["w_enc"].shape[1]
    out_dim = params["w_head"].shape[1]

    # padded sizes / tiles (lane-dense features, 8-aligned node axis)
    if n <= 512:
        n_pad = _round_up(n, 8)
        tm = n_pad
    else:
        tm = 512
        n_pad = _round_up(n, tm)
    h_pad = _round_up(hidden, 128)
    o_pad = _round_up(out_dim, 128)

    a_p = build_norm_adj(edge_index, n_pad)

    # Encoder (+ dropout p=0 + relu) and the first LayerNorm in plain XLA; the
    # kernel carries the normalized activation stream xn from here on.
    h0 = jnp.maximum(
        jnp.dot(x.astype(jnp.float32), params["w_enc"]) + params["b_enc"], 0.0)
    mu = jnp.mean(h0, axis=-1, keepdims=True)
    var = jnp.mean(jnp.square(h0 - mu), axis=-1, keepdims=True)
    xn0 = (h0 - mu) * jax.lax.rsqrt(var + LN_EPS) * params["ln_gamma"] \
        + params["ln_beta"]
    xn0_p = _pad2(xn0, n_pad, h_pad)

    w_stack = jnp.stack(
        [_pad2(w, h_pad, h_pad) for w in params["w_gnn"]]).astype(jnp.bfloat16)
    b_stack = jnp.stack([_pad2(b, 1, h_pad) for b in params["b_gnn"]])
    gamma = _pad2(params["ln_gamma"], 1, h_pad)
    beta = _pad2(params["ln_beta"], 1, h_pad)
    w_head = _pad2(params["w_head"], h_pad, o_pad).astype(jnp.bfloat16)
    b_head = _pad2(params["b_head"], 1, o_pad)

    y_p = mpnn_fused(xn0_p, a_p, w_stack, b_stack, gamma, beta, w_head,
                     b_head, n_real=n, h_real=hidden, tm=tm)
    return y_p[:, :out_dim]


def init_params(key, in_dim, hidden_dim, out_dim, num_layers):
    ks = jax.random.split(key, 2 * num_layers + 4)
    params = {
        "w_enc": jax.random.normal(ks[0], (in_dim, hidden_dim), jnp.float32) * 0.1,
        "b_enc": jnp.reshape(
            jax.random.normal(ks[1], (hidden_dim,), jnp.float32) * 0.01,
            (1, hidden_dim)),
        "w_gnn": [jax.random.normal(ks[2 + 2 * i], (hidden_dim, hidden_dim),
                                    jnp.float32) * 0.1
                  for i in range(num_layers)],
        "b_gnn": [jnp.reshape(
            jax.random.normal(ks[3 + 2 * i], (hidden_dim,), jnp.float32) * 0.01,
            (1, hidden_dim)) for i in range(num_layers)],
        # hidden_layer_norm is a single shared module in the reference model,
        # reused for every hidden LN and the final LN.
        "ln_gamma": jnp.ones((1, hidden_dim), jnp.float32),
        "ln_beta": jnp.zeros((1, hidden_dim), jnp.float32),
        "w_head": jax.random.normal(ks[-2], (hidden_dim, out_dim), jnp.float32) * 0.1,
        "b_head": jnp.reshape(
            jax.random.normal(ks[-1], (out_dim,), jnp.float32) * 0.01,
            (1, out_dim)),
    }
    return params


if __name__ == "__main__":
    NUM_NODES = 16
    NUM_EDGES = 32
    IN_DIM = 8
    HIDDEN_DIM = 32
    OUT_DIM = 4
    NUM_LAYERS = 3

    key = jax.random.PRNGKey(0)
    k_x, k_e, k_p = jax.random.split(key, 3)

    x = jax.random.normal(k_x, (NUM_NODES, IN_DIM), jnp.float32)
    edge_index = jax.random.randint(k_e, (2, NUM_EDGES), 0, NUM_NODES, jnp.int32)
    params = init_params(k_p, IN_DIM, HIDDEN_DIM, OUT_DIM, NUM_LAYERS)

    result = mpnn_forward(x, edge_index, params, num_layers=NUM_LAYERS)
    jax.block_until_ready(result)

    assert result.shape == (1, OUT_DIM)
    assert bool(jnp.all(jnp.isfinite(result)))
    print("KERNEL_OK")
</pallas_src>

<mosaic_0001>
module attributes {stable_mosaic.version = 11 : i64} {
  func.func @_mpnn_fused_kernel(%arg0: i32, %arg1: i32, %arg2: memref<16x128xf32, #tpu.memory_space<vmem>>, %arg3: memref<16x16xbf16, #tpu.memory_space<vmem>>, %arg4: memref<1x128x128xbf16, #tpu.memory_space<vmem>>, %arg5: memref<1x1x128xf32, #tpu.memory_space<vmem>>, %arg6: memref<1x128xf32, #tpu.memory_space<vmem>>, %arg7: memref<1x128xf32, #tpu.memory_space<vmem>>, %arg8: memref<128x128xbf16, #tpu.memory_space<vmem>>, %arg9: memref<1x128xf32, #tpu.memory_space<vmem>>, %arg10: memref<1x128xf32, #tpu.memory_space<vmem>>, %arg11: memref<16x128xf32, #tpu.memory_space<vmem>>, %arg12: memref<16x128xbf16, #tpu.memory_space<vmem>>, %arg13: memref<1x128xf32, #tpu.memory_space<vmem>>) attributes {dimension_semantics = [#tpu.dimension_semantics<arbitrary>, #tpu.dimension_semantics<arbitrary>], iteration_bounds = array<i64: 3, 1>, scalar_prefetch = 0 : i64, scratch_operands = 3 : i64, tpu.core_type = #tpu.core_type<tc>, window_params = [{pipeline_mode = #tpu.pipeline_mode<synchronous>, transform_indices = @transform_0, window_bounds = array<i64: 16, 128>}, {pipeline_mode = #tpu.pipeline_mode<synchronous>, transform_indices = @transform_1, window_bounds = array<i64: 16, 16>}, {transform_indices = @transform_2, window_bounds = array<i64: 1, 128, 128>}, {transform_indices = @transform_3, window_bounds = array<i64: 1, 1, 128>}, {pipeline_mode = #tpu.pipeline_mode<synchronous>, transform_indices = @transform_4, window_bounds = array<i64: 1, 128>}, {pipeline_mode = #tpu.pipeline_mode<synchronous>, transform_indices = @transform_5, window_bounds = array<i64: 1, 128>}, {pipeline_mode = #tpu.pipeline_mode<synchronous>, transform_indices = @transform_6, window_bounds = array<i64: 128, 128>}, {pipeline_mode = #tpu.pipeline_mode<synchronous>, transform_indices = @transform_7, window_bounds = array<i64: 1, 128>}, {pipeline_mode = #tpu.pipeline_mode<synchronous>, transform_indices = @transform_8, window_bounds = array<i64: 1, 128>}]} {
    %c0_i32 = arith.constant 0 : i32
    %0 = arith.cmpi eq, %arg0, %c0_i32 : i32
    %c0_i32_0 = arith.constant 0 : i32
    %1 = arith.cmpi eq, %arg1, %c0_i32_0 : i32
    %2 = arith.andi %0, %1 : i1
    %3 = arith.extui %2 : i1 to i32
    %c0_i32_1 = arith.constant 0 : i32
    %4 = arith.cmpi ne, %3, %c0_i32_1 : i32
    scf.if %4 {
      %c0_20 = arith.constant 0 : index
      %c0_21 = arith.constant 0 : index
      %39 = vector.load %arg2[%c0_20, %c0_21] : memref<16x128xf32, #tpu.memory_space<vmem>>, vector<16x128xf32>
      %c0_22 = arith.constant 0 : index
      %c0_23 = arith.constant 0 : index
      %40 = vector.load %arg11[%c0_22, %c0_23] : memref<16x128xf32, #tpu.memory_space<vmem>>, vector<16x128xf32>
      tpu.vector_store %arg11[%c0_22, %c0_23], %39 {strides = array<i32>} : memref<16x128xf32, #tpu.memory_space<vmem>>, vector<16x128xf32>,
    } else {
    }
    %c0_i32_2 = arith.constant 0 : i32
    %5 = arith.cmpi eq, %arg1, %c0_i32_2 : i32
    %6 = arith.extui %5 : i1 to i32
    %c0_i32_3 = arith.constant 0 : i32
    %7 = arith.cmpi ne, %6, %c0_i32_3 : i32
    scf.if %7 {
      %c0_20 = arith.constant 0 : index
      %c0_21 = arith.constant 0 : index
      %39 = vector.load %arg11[%c0_20, %c0_21] : memref<16x128xf32, #tpu.memory_space<vmem>>, vector<16x128xf32>
      %40 = arith.truncf %39 : vector<16x128xf32> to vector<16x128xbf16>
      %c0_22 = arith.constant 0 : index
      %c0_23 = arith.constant 0 : index
      %c0_24 = arith.constant 0 : index
      %41 = vector.load %arg4[%c0_22, %c0_23, %c0_24] : memref<1x128x128xbf16, #tpu.memory_space<vmem>>, vector<1x128x128xbf16>
      %42 = vector.shape_cast %41 : vector<1x128x128xbf16> to vector<128x128xbf16>
      %cst_25 = arith.constant dense<0.000000e+00> : vector<16x128xf32>
      %43 = tpu.matmul %40, %42, %cst_25 {dimension_numbers = #tpu.dot_dimension_numbers<[1], [0], [0], [1], [0, 0, 1, 1], [], []>} : vector<16x128xbf16>, vector<128x128xbf16>, vector<16x128xf32> -> vector<16x128xf32>
      %44 = arith.truncf %43 : vector<16x128xf32> to vector<16x128xbf16>
      %c0_26 = arith.constant 0 : index
      %c0_27 = arith.constant 0 : index
      %45 = vector.load %arg12[%c0_26, %c0_27] : memref<16x128xbf16, #tpu.memory_space<vmem>>, vector<16x128xbf16>
      tpu.vector_store %arg12[%c0_26, %c0_27], %44 {strides = array<i32>} : memref<16x128xbf16, #tpu.memory_space<vmem>>, vector<16x128xbf16>,
    } else {
    }
    %c2_i32 = arith.constant 2 : i32
    %8 = arith.cmpi eq, %arg0, %c2_i32 : i32
    %c0_i32_4 = arith.constant 0 : i32
    %9 = arith.cmpi eq, %arg1, %c0_i32_4 : i32
    %10 = arith.andi %8, %9 : i1
    %11 = arith.extui %10 : i1 to i32
    %c0_i32_5 = arith.constant 0 : i32
    %12 = arith.cmpi ne, %11, %c0_i32_5 : i32
    scf.if %12 {
      %cst_20 = arith.constant 0.000000e+00 : f32
      %39 = vector.broadcast %cst_20 : f32 to vector<1x128xf32>
      %c0_21 = arith.constant 0 : index
      %c0_22 = arith.constant 0 : index
      %40 = vector.load %arg13[%c0_21, %c0_22] : memref<1x128xf32, #tpu.memory_space<vmem>>, vector<1x128xf32>
      tpu.vector_store %arg13[%c0_21, %c0_22], %39 {strides = array<i32>} : memref<1x128xf32, #tpu.memory_space<vmem>>, vector<1x128xf32>,
    } else {
    }
    %c16_i32 = arith.constant 16 : i32
    %13 = arith.muli %arg1, %c16_i32 : i32
    %14 = tpu.assume_multiple %13, 16 : i32
    %15 = arith.index_cast %14 : i32 to index
    %c0 = arith.constant 0 : index
    %16 = vector.load %arg3[%15, %c0] : memref<16x16xbf16, #tpu.memory_space<vmem>>, vector<16x16xbf16>
    %c0_6 = arith.constant 0 : index
    %c0_7 = arith.constant 0 : index
    %17 = vector.load %arg12[%c0_6, %c0_7] : memref<16x128xbf16, #tpu.memory_space<vmem>>, vector<16x128xbf16>
    %cst = arith.constant dense<0.000000e+00> : vector<16x128xf32>
    %18 = tpu.matmul %16, %17, %cst {dimension_numbers = #tpu.dot_dimension_numbers<[1], [0], [0], [1], [0, 0, 1, 1], [], []>} : vector<16x16xbf16>, vector<16x128xbf16>, vector<16x128xf32> -> vector<16x128xf32>
    %c0_8 = arith.constant 0 : index
    %c0_9 = arith.constant 0 : index
    %c0_10 = arith.constant 0 : index
    %19 = vector.load %arg5[%c0_8, %c0_9, %c0_10] : memref<1x1x128xf32, #tpu.memory_space<vmem>>, vector<1x1x128xf32>
    %20 = vector.shape_cast %19 : vector<1x1x128xf32> to vector<1x128xf32>
    %21 = vector.broadcast %20 : vector<1x128xf32> to vector<16x128xf32>
    %22 = arith.addf %18, %21 : vector<16x128xf32>
    %cst_11 = arith.constant 0.000000e+00 : f32
    %23 = vector.broadcast %cst_11 : f32 to vector<16x128xf32>
    %24 = arith.maximumf %22, %23 : vector<16x128xf32>
    %25 = arith.index_cast %14 : i32 to index
    %c0_12 = arith.constant 0 : index
    %26 = vector.load %arg11[%25, %c0_12] : memref<16x128xf32, #tpu.memory_space<vmem>>, vector<16x128xf32>
    %27 = arith.addf %26, %24 : vector<16x128xf32>
    %c2_i32_13 = arith.constant 2 : i32
    %28 = arith.cmpi slt, %arg0, %c2_i32_13 : i32
    %29 = arith.extui %28 : i1 to i32
    %c0_i32_14 = arith.constant 0 : i32
    %30 = arith.cmpi ne, %29, %c0_i32_14 : i32
    scf.if %30 {
      %c0_20 = arith.constant 0 : index
      %c0_21 = arith.constant 0 : index
      %39 = vector.load %arg6[%c0_20, %c0_21] : memref<1x128xf32, #tpu.memory_space<vmem>>, vector<1x128xf32>
      %c0_22 = arith.constant 0 : index
      %c0_23 = arith.constant 0 : index
      %40 = vector.load %arg7[%c0_22, %c0_23] : memref<1x128xf32, #tpu.memory_space<vmem>>, vector<1x128xf32>
      %cst_24 = arith.constant dense<0.000000e+00> : vector<16xf32>
      %41 = vector.multi_reduction <add>, %27, %cst_24 [1] : vector<16x128xf32> to vector<16xf32>
      %42 = vector.shape_cast %41 : vector<16xf32> to vector<16x1xf32>
      %cst_25 = arith.constant 3.125000e-02 : f32
      %43 = vector.broadcast %cst_25 : f32 to vector<16x1xf32>
      %44 = arith.mulf %42, %43 : vector<16x1xf32>
      %45 = vector.broadcast %44 : vector<16x1xf32> to vector<16x128xf32>
      %46 = arith.subf %27, %45 : vector<16x128xf32>
      %47 = arith.mulf %46, %46 : vector<16x128xf32>
      %cst_26 = arith.constant dense<0.000000e+00> : vector<16xf32>
      %48 = vector.multi_reduction <add>, %47, %cst_26 [1] : vector<16x128xf32> to vector<16xf32>
      %49 = vector.shape_cast %48 : vector<16xf32> to vector<16x1xf32>
      %cst_27 = arith.constant 9.600000e+01 : f32
      %50 = vector.broadcast %cst_27 : f32 to vector<16x1xf32>
      %51 = arith.mulf %50, %44 : vector<16x1xf32>
      %52 = arith.mulf %51, %44 : vector<16x1xf32>
      %53 = arith.subf %49, %52 : vector<16x1xf32>
      %cst_28 = arith.constant 3.125000e-02 : f32
      %54 = vector.broadcast %cst_28 : f32 to vector<16x1xf32>
      %55 = arith.mulf %53, %54 : vector<16x1xf32>
      %cst_29 = arith.constant 9.99999974E-6 : f32
      %56 = vector.broadcast %cst_29 : f32 to vector<16x1xf32>
      %57 = arith.addf %55, %56 : vector<16x1xf32>
      %58 = math.rsqrt %57 : vector<16x1xf32>
      %59 = vector.broadcast %58 : vector<16x1xf32> to vector<16x128xf32>
      %60 = arith.mulf %46, %59 : vector<16x128xf32>
      %61 = vector.broadcast %39 : vector<1x128xf32> to vector<16x128xf32>
      %62 = arith.mulf %60, %61 : vector<16x128xf32>
      %63 = vector.broadcast %40 : vector<1x128xf32> to vector<16x128xf32>
      %64 = arith.addf %62, %63 : vector<16x128xf32>
      %65 = arith.index_cast %14 : i32 to index
      %c0_30 = arith.constant 0 : index
      %66 = vector.load %arg11[%65, %c0_30] : memref<16x128xf32, #tpu.memory_space<vmem>>, vector<16x128xf32>
      tpu.vector_store %arg11[%65, %c0_30], %64 {strides = array<i32>} : memref<16x128xf32, #tpu.memory_space<vmem>>, vector<16x128xf32>,
    } else {
    }
    %c2_i32_15 = arith.constant 2 : i32
    %31 = arith.cmpi eq, %arg0, %c2_i32_15 : i32
    %32 = arith.extui %31 : i1 to i32
    %c0_i32_16 = arith.constant 0 : i32
    %33 = arith.cmpi ne, %32, %c0_i32_16 : i32
    scf.if %33 {
      %c0_20 = arith.constant 0 : index
      %c0_21 = arith.constant 0 : index
      %39 = vector.load %arg6[%c0_20, %c0_21] : memref<1x128xf32, #tpu.memory_space<vmem>>, vector<1x128xf32>
      %c0_22 = arith.constant 0 : index
      %c0_23 = arith.constant 0 : index
      %40 = vector.load %arg7[%c0_22, %c0_23] : memref<1x128xf32, #tpu.memory_space<vmem>>, vector<1x128xf32>
      %cst_24 = arith.constant dense<0.000000e+00> : vector<16xf32>
      %41 = vector.multi_reduction <add>, %27, %cst_24 [1] : vector<16x128xf32> to vector<16xf32>
      %42 = vector.shape_cast %41 : vector<16xf32> to vector<16x1xf32>
      %cst_25 = arith.constant 3.125000e-02 : f32
      %43 = vector.broadcast %cst_25 : f32 to vector<16x1xf32>
      %44 = arith.mulf %42, %43 : vector<16x1xf32>
      %45 = vector.broadcast %44 : vector<16x1xf32> to vector<16x128xf32>
      %46 = arith.subf %27, %45 : vector<16x128xf32>
      %47 = arith.mulf %46, %46 : vector<16x128xf32>
      %cst_26 = arith.constant dense<0.000000e+00> : vector<16xf32>
      %48 = vector.multi_reduction <add>, %47, %cst_26 [1] : vector<16x128xf32> to vector<16xf32>
      %49 = vector.shape_cast %48 : vector<16xf32> to vector<16x1xf32>
      %cst_27 = arith.constant 9.600000e+01 : f32
      %50 = vector.broadcast %cst_27 : f32 to vector<16x1xf32>
      %51 = arith.mulf %50, %44 : vector<16x1xf32>
      %52 = arith.mulf %51, %44 : vector<16x1xf32>
      %53 = arith.subf %49, %52 : vector<16x1xf32>
      %cst_28 = arith.constant 3.125000e-02 : f32
      %54 = vector.broadcast %cst_28 : f32 to vector<16x1xf32>
      %55 = arith.mulf %53, %54 : vector<16x1xf32>
      %cst_29 = arith.constant 9.99999974E-6 : f32
      %56 = vector.broadcast %cst_29 : f32 to vector<16x1xf32>
      %57 = arith.addf %55, %56 : vector<16x1xf32>
      %58 = math.rsqrt %57 : vector<16x1xf32>
      %59 = vector.broadcast %58 : vector<16x1xf32> to vector<16x128xf32>
      %60 = arith.mulf %46, %59 : vector<16x128xf32>
      %61 = vector.broadcast %39 : vector<1x128xf32> to vector<16x128xf32>
      %62 = arith.mulf %60, %61 : vector<16x128xf32>
      %63 = vector.broadcast %40 : vector<1x128xf32> to vector<16x128xf32>
      %64 = arith.addf %62, %63 : vector<16x128xf32>
      %65 = tpu.iota {dimensions = array<i32: 0>} : vector<16x128xi32>
      %66 = vector.broadcast %13 : i32 to vector<16x128xi32>
      %67 = arith.addi %65, %66 : vector<16x128xi32>
      %c16_i32_30 = arith.constant 16 : i32
      %68 = vector.broadcast %c16_i32_30 : i32 to vector<16x128xi32>
      %69 = arith.cmpi slt, %67, %68 : vector<16x128xi32>
      %cst_31 = arith.constant 0.000000e+00 : f32
      %70 = vector.broadcast %cst_31 : f32 to vector<16x128xf32>
      %71 = arith.select %69, %64, %70 : vector<16x128xi1>, vector<16x128xf32>
      %c0_32 = arith.constant 0 : index
      %c0_33 = arith.constant 0 : index
      %72 = vector.load %arg13[%c0_32, %c0_33] : memref<1x128xf32, #tpu.memory_space<vmem>>, vector<1x128xf32>
      %cst_34 = arith.constant dense<0.000000e+00> : vector<128xf32>
      %73 = vector.multi_reduction <add>, %71, %cst_34 [0] : vector<16x128xf32> to vector<128xf32>
      %74 = vector.shape_cast %73 : vector<128xf32> to vector<1x128xf32>
      %75 = arith.addf %72, %74 : vector<1x128xf32>
      %c0_35 = arith.constant 0 : index
      %c0_36 = arith.constant 0 : index
      %76 = vector.load %arg13[%c0_35, %c0_36] : memref<1x128xf32, #tpu.memory_space<vmem>>, vector<1x128xf32>
      tpu.vector_store %arg13[%c0_35, %c0_36], %75 {strides = array<i32>} : memref<1x128xf32, #tpu.memory_space<vmem>>, vector<1x128xf32>,
    } else {
    }
    %c2_i32_17 = arith.constant 2 : i32
    %34 = arith.cmpi eq, %arg0, %c2_i32_17 : i32
    %c0_i32_18 = arith.constant 0 : i32
    %35 = arith.cmpi eq, %arg1, %c0_i32_18 : i32
    %36 = arith.andi %34, %35 : i1
    %37 = arith.extui %36 : i1 to i32
    %c0_i32_19 = arith.constant 0 : i32
    %38 = arith.cmpi ne, %37, %c0_i32_19 : i32
    scf.if %38 {
      %c0_20 = arith.constant 0 : index
      %c0_21 = arith.constant 0 : index
      %39 = vector.load %arg13[%c0_20, %c0_21] : memref<1x128xf32, #tpu.memory_space<vmem>>, vector<1x128xf32>
      %cst_22 = arith.constant 6.250000e-02 : f32
      %40 = vector.broadcast %cst_22 : f32 to vector<1x128xf32>
      %41 = arith.mulf %39, %40 : vector<1x128xf32>
      %42 = arith.truncf %41 : vector<1x128xf32> to vector<1x128xbf16>
      %c0_23 = arith.constant 0 : index
      %c0_24 = arith.constant 0 : index
      %43 = vector.load %arg8[%c0_23, %c0_24] : memref<128x128xbf16, #tpu.memory_space<vmem>>, vector<128x128xbf16>
      %cst_25 = arith.constant dense<0.000000e+00> : vector<1x128xf32>
      %44 = tpu.matmul %42, %43, %cst_25 {dimension_numbers = #tpu.dot_dimension_numbers<[1], [0], [0], [1], [0, 0, 1, 1], [], []>} : vector<1x128xbf16>, vector<128x128xbf16>, vector<1x128xf32> -> vector<1x128xf32>
      %c0_26 = arith.constant 0 : index
      %c0_27 = arith.constant 0 : index
      %45 = vector.load %arg9[%c0_26, %c0_27] : memref<1x128xf32, #tpu.memory_space<vmem>>, vector<1x128xf32>
      %46 = arith.addf %44, %45 : vector<1x128xf32>
      %c0_28 = arith.constant 0 : index
      %c0_29 = arith.constant 0 : index
      %47 = vector.load %arg10[%c0_28, %c0_29] : memref<1x128xf32, #tpu.memory_space<vmem>>, vector<1x128xf32>
      tpu.vector_store %arg10[%c0_28, %c0_29], %46 {strides = array<i32>} : memref<1x128xf32, #tpu.memory_space<vmem>>, vector<1x128xf32>,
    } else {
    }
    return
  }
  func.func @transform_0(%arg0: i32, %arg1: i32) -> (i32, i32) {
    %c0_i32 = arith.constant 0 : i32
    %c0_i32_0 = arith.constant 0 : i32
    %c0_i32_1 = arith.constant 0 : i32
    return %c0_i32, %c0_i32_0 : i32, i32
  }
  func.func @transform_1(%arg0: i32, %arg1: i32) -> (i32, i32) {
    %c0_i32 = arith.constant 0 : i32
    %c0_i32_0 = arith.constant 0 : i32
    %c0_i32_1 = arith.constant 0 : i32
    return %c0_i32, %c0_i32_0 : i32, i32
  }
  func.func @transform_2(%arg0: i32, %arg1: i32) -> (i32, i32, i32) {
    %c0_i32 = arith.constant 0 : i32
    %c0_i32_0 = arith.constant 0 : i32
    %c0_i32_1 = arith.constant 0 : i32
    return %arg0, %c0_i32, %c0_i32_0 : i32, i32, i32
  }
  func.func @transform_3(%arg0: i32, %arg1: i32) -> (i32, i32, i32) {
    %c0_i32 = arith.constant 0 : i32
    %c0_i32_0 = arith.constant 0 : i32
    %c0_i32_1 = arith.constant 0 : i32
    return %arg0, %c0_i32, %c0_i32_0 : i32, i32, i32
  }
  func.func @transform_4(%arg0: i32, %arg1: i32) -> (i32, i32) {
    %c0_i32 = arith.constant 0 : i32
    %c0_i32_0 = arith.constant 0 : i32
    %c0_i32_1 = arith.constant 0 : i32
    return %c0_i32, %c0_i32_0 : i32, i32
  }
  func.func @transform_5(%arg0: i32, %arg1: i32) -> (i32, i32) {
    %c0_i32 = arith.constant 0 : i32
    %c0_i32_0 = arith.constant 0 : i32
    %c0_i32_1 = arith.constant 0 : i32
    return %c0_i32, %c0_i32_0 : i32, i32
  }
  func.func @transform_6(%arg0: i32, %arg1: i32) -> (i32, i32) {
    %c0_i32 = arith.constant 0 : i32
    %c0_i32_0 = arith.constant 0 : i32
    %c0_i32_1 = arith.constant 0 : i32
    return %c0_i32, %c0_i32_0 : i32, i32
  }
  func.func @transform_7(%arg0: i32, %arg1: i32) -> (i32, i32) {
    %c0_i32 = arith.constant 0 : i32
    %c0_i32_0 = arith.constant 0 : i32
    %c0_i32_1 = arith.constant 0 : i32
    return %c0_i32, %c0_i32_0 : i32, i32
  }
  func.func @transform_8(%arg0: i32, %arg1: i32) -> (i32, i32) {
    %c0_i32 = arith.constant 0 : i32
    %c0_i32_0 = arith.constant 0 : i32
    %c0_i32_1 = arith.constant 0 : i32
    return %c0_i32, %c0_i32_0 : i32, i32
  }
}

</mosaic_0001>

<bundles_post_ra>
// kernel: mpnn_forward.1
= control target key start
LH: loop header
LB: loop body
LE: loop exit
PB: predicated region body
PF: predicated region fallthrough
CT: control target
= control target key end

     0   :  { %13 = vsyncpa [#allocation6], 0  ;;  %s1032_s27 = smov 0   ;;  %s1034_s28 = smov 0   ;;  %s1152_s0 = inlined_call_operand.vmem [shape: f32[16,128], index: 0, kind: input, shape index: {}]   ;;  %s1153_s1 = inlined_call_operand.vmem [shape: bf16[16,16], index: 1, kind: input, shape index: {}]   ;;  %s1154_s2 = inlined_call_operand.vmem [shape: bf16[3,128,128], index: 2, kind: input, shape index: {}]   ;;  %s1155_s3 = inlined_call_operand.vmem [shape: f32[3,1,128], index: 3, kind: input, shape index: {}]   ;;  %s1156_s4 = inlined_call_operand.vmem [shape: f32[1,128], index: 4, kind: input, shape index: {}]   ;;  %s1157_s5 = inlined_call_operand.vmem [shape: f32[1,128], index: 5, kind: input, shape index: {}]   ;;  %s1158_s6 = inlined_call_operand.vmem [shape: bf16[128,128], index: 6, kind: input, shape index: {}]   ;;  %s1159_s7 = inlined_call_operand.vmem [shape: f32[1,128], index: 7, kind: input, shape index: {}]   ;;  %s1160_s8 = inlined_call_operand.hbm [shape: f32[1,128], index: 8, kind: output, shape index: {}]  }
   0x1   :  { %s1036_s29 = smov 0  }
   0x2 LB: > { %s771_s30 = sadd.s32 4294967295, %s983_s29   ;;  %s31_s9 = sadd.s32 1, %s979_s28  ;;  %s983_s29 = sphi %s1036_s29, %s19_s29   ;;  %s979_s28 = sphi %s1034_s28, %s1162_s28   ;;  %s975_s27 = sphi %s1032_s27, %s1161_s27  }
   0x3   : > { %p33_p0 = scmp.ge.s32.totalorder %s31_s9, 3  ;;  %p774_p1 = scmp.ge.s32.totalorder %s983_s29, 1 }
   0x4   : > { %p278_p2 = scmp.lt.s32.totalorder %s983_s29, 4 }
   0x5   : > { %s1164_s9 = smov (%p33_p0, %s31_s9), 0 }
   0x6   : > { %p279_p3 = pnand %p774_p1, %p278_p2 }
   0x7   : > { %p310_p4 = scmp.lt.s32.totalorder (!%p279_p3), %s975_s27, 2  ;;  %p319_p5 = scmp.eq.s32.totalorder (!%p279_p3), %s975_s27, 0 }
   0x8   : > { %282 = sbr.rel (%p279_p3) target bundleno = 1086 (0x43e), region = 52 }
   0xd   : > { %s1056_s10 = scalar_select %p310_p4, %s975_s27, 2  ;;  %v325_v0 = vld [vmem:[%s1152_s0] sm:$0xff] (%p319_p5)  ;;  %v326_v1 = vld [vmem:[%s1152_s0 + $0x8] sm:$0xff] (%p319_p5) }
   0xe   : > { %324 = sbr.rel (!%p319_p5) target bundleno = 19 (0x13), region = 56  ;;  %327 = vst [vmem:[#allocation2] sm:$0xff] (%p319_p5), %v325_v0 }
   0xf   : > { %s858_s11 = sshll.u32 %s1056_s10, 6  ;;  %s317_s14 = scalar_lea.vmem %s1155_s3, %s1056_s10  ;;  %328 = vst [vmem:[#allocation2 + $0x8] sm:$0xff] (%p319_p5), %v326_v1 }
  0x10   : > { %s314_s17 = scalar_lea.vmem %s1154_s2, %s858_s11 }
  0x13 PF: > { %v867_v2 = vld [vmem:[%s314_s17 + $0x38] sm:$0xff]  ;;  %v866_v3 = vld [vmem:[%s314_s17 + $0x30] sm:$0xff]  ;;  %v865_v4 = vld [vmem:[%s314_s17 + $0x28] sm:$0xff]  ;;  %p417_p6 = scmp.eq.s32.totalorder %s975_s27, 2 }
  0x14   : > { %399 = vmatpush.bf16.msra.mxu0 %v867_v2  ;;  %v864_v5 = vld [vmem:[%s314_s17 + $0x20] sm:$0xff]  ;;  %v863_v6 = vld [vmem:[%s314_s17 + $0x18] sm:$0xff]  ;;  %v862_v7 = vld [vmem:[%s314_s17 + $0x10] sm:$0xff]  ;;  %v985_v16 = vmov (%p417_p6), 0.0  }
  0x15   : > { %v861_v8 = vld [vmem:[%s314_s17 + $0x8] sm:$0xff]  ;;  %v860_v9 = vld [vmem:[%s314_s17] sm:$0xff]  ;;  %422 = vst [vmem:[#allocation4] sm:$0x1] (%p417_p6), %v985_v16 }
  0x16   : > { %v332_v10 = vld [vmem:[#allocation2] sm:$0xff]  ;;  %v333_v11 = vld [vmem:[#allocation2 + $0x8] sm:$0xff] }
  0x17   : > { %v334_v12 = vpack.c.bf16 %v333_v11, %v332_v10 }
  0x18   : > { %400 = vmatpush.bf16.msra.mxu0 %v866_v3 }
  0x1c   : > { %401 = vmatpush.bf16.msra.mxu0 %v865_v4 }
  0x20   : > { %402 = vmatpush.bf16.msra.mxu0 %v864_v5 }
  0x24   : > { %403 = vmatpush.bf16.msra.mxu0 %v863_v6 }
  0x28   : > { %404 = vmatpush.bf16.msra.mxu0 %v862_v7 }
  0x2c   : > { %405 = vmatpush.bf16.msra.mxu0 %v861_v8 }
  0x30   : > { %406 = vmatpush.bf16.msra.mxu0 %v860_v9 }
  0x33   : > { %407 = vmatmul.bf16.vlgmr.msra.gmra.mxu0 %v334_v12 }
  0xb0   : > { %v408_v13 = vpop.f32.mrf.mxu0 }
  0xb7   : > { %421 = sbr.rel (!%p417_p6) target bundleno = 188 (0xbc), region = 64 }
  0xb8   : > { %v410_v14 = vpop.f32.mrf.mxu0 }
  0xb9   : > { %v882_v15 = vpack.c.bf16 %v410_v14, %v408_v13 }
  0xbb   : > { %883 = vst [vmem:[#allocation3] sm:$0xff] %v882_v15  }
  0xbc PF: > { %v869_v18 = vld [vmem:[%s1153_s1] sm:$0xff]  ;;  %vm447_vm0 = vcmask 130048   ;;  %v469_v27 = vld [vmem:[#allocation2 + $0x8] sm:$0xff]  ;;  %p820_p7 = scmp.ge.s32.totalorder %s975_s27, 2 }
  0xbd   : > { %v916_v19 = vld [vmem:[%s317_s14] ss:$0 sm:$0xff] }
  0xbe   : > { %v468_v22 = vld [vmem:[#allocation2] sm:$0xff] }
  0xc2   : > { %v870_v17 = vld [vmem:[#allocation3] sm:$0xff] }
  0xc3   : > { %458 = vmatpush.bf16.msra.mxu1 %v870_v17 }
  0xc6   : > { %819 = vmatmul.msk.bf16.vlgmr.msra.gmra.mxu1 %vm447_vm0, %v869_v18 }
 0x143   : > { %v460_v20 = vpop.f32.mrf.mxu1 }
 0x144   : > { %v461_v21 = vadd.f32 %v916_v19, %v460_v20 }
 0x146   : > { %v465_v23 = vmax.f32 %v461_v21, 0.0 }
 0x148   : > { %v1083_v24 = vadd.f32 %v468_v22, %v465_v23 }
 0x14b   : > { %v462_v25 = vpop.f32.mrf.mxu1 }
 0x14c   : > { %v463_v26 = vadd.f32 %v916_v19, %v462_v25  ;;  %475 = sbr.rel (%p820_p7) target bundleno = 614 (0x266), region = 68 }
 0x14e   : > { %v466_v28 = vmax.f32 %v463_v26, 0.0 }
 0x150   : > { %v1085_v29 = vadd.f32 %v469_v27, %v466_v28 }
 0x151   : > { %478 = vadd.xlane.f32.xlu0 %v1083_v24  ;;  %v917_v58 = vld [vmem:[%s1156_s4] ss:$0 sm:$0xff] }
 0x152   : > { %v918_v62 = vld [vmem:[%s1157_s5] ss:$0 sm:$0xff] }
 0x159   : > { %480 = vadd.xlane.f32.xlu0 %v1085_v29 }
 0x1c4   : > { %v479_v30 = vpop.xlane.xlu0 %478 }
 0x1c5   : > { %v482_v31 = vmul.f32 0.03125, %v479_v30 }
 0x1c7   : > { %v484_v32 = vsub.f32 %v1083_v24, %v482_v31  ;;  %v492_v38 = vmul.f32 96.0, %v482_v31 }
 0x1c9   : > { %v486_v33 = vmul.f32 %v484_v32, %v484_v32  ;;  %v494_v39 = vmul.f32 %v492_v38, %v482_v31 }
 0x1cb   : > { %488 = vadd.xlane.f32.xlu1 %v486_v33 }
 0x1cc   : > { %v481_v34 = vpop.xlane.xlu0 %480 }
 0x1cd   : > { %v483_v35 = vmul.f32 0.03125, %v481_v34 }
 0x1cf   : > { %v485_v36 = vsub.f32 %v1085_v29, %v483_v35  ;;  %v493_v42 = vmul.f32 96.0, %v483_v35 }
 0x1d1   : > { %v487_v37 = vmul.f32 %v485_v36, %v485_v36  ;;  %v495_v45 = vmul.f32 %v493_v42, %v483_v35 }
 0x1d3   : > { %490 = vadd.xlane.f32.xlu1 %v487_v37 }
 0x23e   : > { %v489_v40 = vpop.xlane.xlu1 %488 }
 0x23f   : > { %v496_v41 = vsub.f32 %v489_v40, %v494_v39 }
 0x241   : > { %v498_v43 = vmul.f32 0.03125, %v496_v41 }
 0x243   : > { %v500_v44 = vadd.f32 1e-05, %v498_v43 }
 0x245   : > { %919 = vrsqrt.f32 %v500_v44  ;;  %vm508_vm2 = vweird.f32 %v500_v44 }
 0x246   : > { %v491_v46 = vpop.xlane.xlu1 %490 }
 0x247   : > { %v497_v47 = vsub.f32 %v491_v46, %v495_v45 }
 0x249   : > { %v499_v48 = vmul.f32 0.03125, %v497_v47 }
 0x24b   : > { %v920_v49 = vpop.eup %919  ;;  %v501_v50 = vadd.f32 1e-05, %v499_v48 }
 0x24c   : > { %v503_v51 = vmul.f32 %v920_v49, %v500_v44  ;;  %vm509_vm1 = vweird.f32 %v920_v49 }
 0x24d   : > { %921 = vrsqrt.f32 %v501_v50  ;;  %vm510_vm3 = vmor %vm508_vm2, %vm509_vm1  ;;  %vm518_vm5 = vweird.f32 %v501_v50 }
 0x24e   : > { %v504_v52 = vmul.f32 %v920_v49, %v503_v51 }
 0x250   : > { %v505_v53 = vmul.f32 0.5, %v504_v52 }
 0x252   : > { %v506_v54 = vsub.f32 1.5, %v505_v53 }
 0x253   : > { %v922_v55 = vpop.eup %921 }
 0x254   : > { %v507_v56 = vmul.f32 %v920_v49, %v506_v54  ;;  %v513_v57 = vmul.f32 %v922_v55, %v501_v50  ;;  %vm519_vm4 = vweird.f32 %v922_v55 }
 0x255   : > { %vm520_vm6 = vmor %vm518_vm5, %vm519_vm4 }
 0x256   : > { %v511_v59 = vsel %vm510_vm3, %v920_v49, %v507_v56  ;;  %v514_v60 = vmul.f32 %v922_v55, %v513_v57 }
 0x257   : > { %v522_v61 = vmul.f32 %v511_v59, %v484_v32 }
 0x258   : > { %v515_v63 = vmul.f32 0.5, %v514_v60 }
 0x259   : > { %v527_v0 = vmul.f32 %v917_v58, %v522_v61 }
 0x25a   : > { %v516_v1 = vsub.f32 1.5, %v515_v63 }
 0x25b   : > { %v532_v2 = vadd.f32 %v918_v62, %v527_v0 }
 0x25c   : > { %v517_v3 = vmul.f32 %v922_v55, %v516_v1 }
 0x25d   : > { %534 = vst [vmem:[#allocation2] sm:$0xff] %v532_v2 }
 0x25e   : > { %v521_v4 = vsel %vm520_vm6, %v922_v55, %v517_v3 }
 0x25f   : > { %v523_v5 = vmul.f32 %v521_v4, %v485_v36 }
 0x261   : > { %v528_v6 = vmul.f32 %v917_v58, %v523_v5 }
 0x263   : > { %v533_v7 = vadd.f32 %v918_v62, %v528_v6 }
 0x265   : > { %535 = vst [vmem:[#allocation2 + $0x8] sm:$0xff] %v533_v7 }
 0x266 PF: > { %p821_p8 = scmp.ne.s32.totalorder %s975_s27, 2 }
 0x268   : > { %538 = sbr.rel (%p821_p8) target bundleno = 914 (0x392), region = 72 }
 0x26d   : > { %541 = vadd.xlane.f32.xlu0 %v1083_v24  ;;  %v923_v41 = vld [vmem:[%s1156_s4] ss:$0 sm:$0xff]  ;;  %v607_v56 = vld [vmem:[#allocation4] sm:$0x1] }
 0x26e   : > { %v924_v45 = vld [vmem:[%s1157_s5] ss:$0 sm:$0xff] }
 0x275   : > { %543 = vadd.xlane.f32.xlu0 %v1085_v29 }
 0x2e0   : > { %v542_v8 = vpop.xlane.xlu0 %541 }
 0x2e1   : > { %v545_v9 = vmul.f32 0.03125, %v542_v8 }
 0x2e3   : > { %v547_v10 = vsub.f32 %v1083_v24, %v545_v9  ;;  %v555_v16 = vmul.f32 96.0, %v545_v9 }
 0x2e5   : > { %v549_v11 = vmul.f32 %v547_v10, %v547_v10  ;;  %v557_v17 = vmul.f32 %v555_v16, %v545_v9 }
 0x2e7   : > { %551 = vadd.xlane.f32.xlu1 %v549_v11 }
 0x2e8   : > { %v544_v12 = vpop.xlane.xlu0 %543 }
 0x2e9   : > { %v546_v13 = vmul.f32 0.03125, %v544_v12 }
 0x2eb   : > { %v548_v14 = vsub.f32 %v1085_v29, %v546_v13  ;;  %v556_v20 = vmul.f32 96.0, %v546_v13 }
 0x2ed   : > { %v550_v15 = vmul.f32 %v548_v14, %v548_v14  ;;  %v558_v23 = vmul.f32 %v556_v20, %v546_v13 }
 0x2ef   : > { %553 = vadd.xlane.f32.xlu1 %v550_v15 }
 0x35a   : > { %v552_v18 = vpop.xlane.xlu1 %551 }
 0x35b   : > { %v559_v19 = vsub.f32 %v552_v18, %v557_v17 }
 0x35d   : > { %v561_v21 = vmul.f32 0.03125, %v559_v19 }
 0x35f   : > { %v563_v22 = vadd.f32 1e-05, %v561_v21 }
 0x361   : > { %925 = vrsqrt.f32 %v563_v22  ;;  %vm571_vm8 = vweird.f32 %v563_v22 }
 0x362   : > { %v554_v25 = vpop.xlane.xlu1 %553 }
 0x363   : > { %v560_v26 = vsub.f32 %v554_v25, %v558_v23 }
 0x365   : > { %v562_v24 = vmul.f32 0.03125, %v560_v26 }
 0x367   : > { %v926_v27 = vpop.eup %925  ;;  %v564_v28 = vadd.f32 1e-05, %v562_v24 }
 0x368   : > { %v566_v30 = vmul.f32 %v926_v27, %v563_v22  ;;  %vm572_vm7 = vweird.f32 %v926_v27 }
 0x369   : > { %927 = vrsqrt.f32 %v564_v28  ;;  %vm573_vm9 = vmor %vm571_vm8, %vm572_vm7  ;;  %vm581_vm11 = vweird.f32 %v564_v28 }
 0x36a   : > { %v567_v31 = vmul.f32 %v926_v27, %v566_v30 }
 0x36c   : > { %v568_v29 = vmul.f32 0.5, %v567_v31 }
 0x36e   : > { %v569_v32 = vsub.f32 1.5, %v568_v29 }
 0x36f   : > { %v928_v33 = vpop.eup %927 }
 0x370   : > { %v570_v34 = vmul.f32 %v926_v27, %v569_v32  ;;  %v576_v35 = vmul.f32 %v928_v33, %v564_v28  ;;  %vm582_vm10 = vweird.f32 %v928_v33 }
 0x371   : > { %vm583_vm12 = vmor %vm581_vm11, %vm582_vm10 }
 0x372   : > { %v577_v36 = vmul.f32 %v928_v33, %v576_v35  ;;  %v574_v37 = vsel %vm573_vm9, %v926_v27, %v570_v34 }
 0x373   : > { %v585_v40 = vmul.f32 %v574_v37, %v547_v10 }
 0x374   : > { %v578_v38 = vmul.f32 0.5, %v577_v36 }
 0x375   : > { %v590_v44 = vmul.f32 %v923_v41, %v585_v40 }
 0x376   : > { %v579_v39 = vsub.f32 1.5, %v578_v38 }
 0x377   : > { %v595_v48 = vadd.f32 %v924_v45, %v590_v44 }
 0x378   : > { %v580_v42 = vmul.f32 %v928_v33, %v579_v39 }
 0x37a   : > { %v584_v43 = vsel %vm583_vm12, %v928_v33, %v580_v42 }
 0x37b   : > { %v586_v46 = vmul.f32 %v584_v43, %v548_v14 }
 0x37d   : > { %v591_v47 = vmul.f32 %v923_v41, %v586_v46 }
 0x37f   : > { %v596_v49 = vadd.f32 %v924_v45, %v591_v47 }
 0x381   : > { %v608_v50 = vadd.f32 %v596_v49, %v595_v48 }
 0x383   : > { %v609_v51 = vrot.slane %v608_v50, 4 }
 0x385   : > { %v610_v52 = vadd.f32 %v609_v51, %v608_v50 }
 0x387   : > { %v611_v53 = vrot.slane %v610_v52, 2 }
 0x389   : > { %v612_v54 = vadd.f32 %v611_v53, %v610_v52 }
 0x38b   : > { %v613_v55 = vrot.slane %v612_v54, 1 }
 0x38d   : > { %v614_v57 = vadd.f32 %v613_v55, %v612_v54 }
 0x38f   : > { %v615_v58 = vadd.f32 %v614_v57, %v607_v56 }
 0x391   : > { %616 = vst [vmem:[#allocation4] sm:$0x1] %v615_v58 }
 0x392 PF: > { %618 = sbr.rel (!%p417_p6) target bundleno = 1080 (0x438), region = 76  ;;  %v878_v59 = vld [vmem:[%s1158_s6 + $0x38] sm:$0xff] (%p417_p6)  ;;  %v877_v60 = vld [vmem:[%s1158_s6 + $0x30] sm:$0xff] (%p417_p6)  ;;  %v876_v61 = vld [vmem:[%s1158_s6 + $0x28] sm:$0xff] (%p417_p6) }
 0x393   : > { %687 = vmatpush.bf16.msra.mxu0 (%p417_p6), %v878_v59  ;;  %v875_v62 = vld [vmem:[%s1158_s6 + $0x20] sm:$0xff] (%p417_p6)  ;;  %v874_v63 = vld [vmem:[%s1158_s6 + $0x18] sm:$0xff] (%p417_p6)  ;;  %v873_v0 = vld [vmem:[%s1158_s6 + $0x10] sm:$0xff] (%p417_p6) }
 0x394   : > { %v872_v1 = vld [vmem:[%s1158_s6 + $0x8] sm:$0xff] (%p417_p6)  ;;  %v871_v4 = vld [vmem:[%s1158_s6] sm:$0xff] (%p417_p6) }
 0x395   : > { %v638_v6 = vld [vmem:[%s1159_s7] sm:$0x1] (%p417_p6) }
 0x397   : > { %688 = vmatpush.bf16.msra.mxu0 %v877_v60 }
 0x398   : > { %v619_v2 = vld [vmem:[#allocation4] sm:$0x1] }
 0x399   : > { %v620_v3 = vmul.f32 0.0625, %v619_v2 }
 0x39b   : > { %689 = vmatpush.bf16.msra.mxu0 %v876_v61  ;;  %v621_v5 = vpack.c.bf16 %v620_v3, %v620_v3 }
 0x39f   : > { %690 = vmatpush.bf16.msra.mxu0 %v875_v62 }
 0x3a3   : > { %691 = vmatpush.bf16.msra.mxu0 %v874_v63 }
 0x3a7   : > { %692 = vmatpush.bf16.msra.mxu0 %v873_v0 }
 0x3ab   : > { %693 = vmatpush.bf16.msra.mxu0 %v872_v1 }
 0x3af   : > { %694 = vmatpush.bf16.msra.mxu0 %v871_v4 }
 0x3b2   : > { %695 = vmatmul.bf16.vlgmr.msra.gmra.mxu0 %v621_v5 }
 0x42f   : > { %v696_v7 = vpop.f32.mrf.mxu0 }
 0x430   : > { %v697_v8 = vadd.f32 %v696_v7, %v638_v6 }
 0x432   : > { %700 = vst [vmem:[#allocation5] sm:$0x1] %v697_v8 }
 0x437   : > { %v698_v9 = vpop.f32.mrf.mxu0 }
 0x438 PF: > { %p888_p9 = scmp.eq.s32.totalorder %s771_s30, 2  ;;  %s709_s19 = sshll.u32 %s1160_s8, 4  ;;  %s710_s19 = int_to_ptr.hbm [resolvable:$true] %s709_s19 }
 0x439   : > { %s986_s20 = smov [#allocation5]  }
 0x43a   : > { %s707_s21 = sshll.u32 %s986_s20, 4  ;;  %s708_s21 = int_to_ptr.vmem [resolvable:$true] %s707_s21 }
 0x43b   : > { %885 = dma.vmem_to_hbm [thread:$0]  (%p888_p9), %s708_s21, 16, %s710_s19, [#allocation6]  }
 0x43c   : > { %970 = dma.done.wait (%p888_p9), [#allocation6], 16  }
 0x43d   : > { %972 = vsyncadd (%p888_p9), [#allocation6], 4294967280 }
 0x43e PF: > { %s19_s29 = sadd.s32 1, %s983_s29   ;;  %s1161_s27 = smov %s979_s28 }
 0x43f   : > { %p16_p10 = scmp.ge.s32.totalorder %s19_s29, 5   ;;  %s1162_s28 = smov %s1164_s9 }
 0x441   :  { %18 = sbr.rel (!%p16_p10) target bundleno = 2 (0x2), region = 108 }
 0x446   :  { %723 = vsyncpa [#allocation6], 1 }
 0x447   :  { %725 = vsyncpa [#allocation6 + $0x1], 1 }

</bundles_post_ra>
